<compile_context>
chip_gen: v6e
topology: v6e:2x2x1
jax: 0.10.0
libtpu: 0.0.40
codegen_flags: <defaults>
</compile_context>

<pallas_src>
import jax
import jax.numpy as jnp
from jax.experimental import pallas as pl
from jax.experimental.pallas import tpu as pltpu


def gaussian_kernel(x_ref, sigma_ref, mu_ref, o_ref):
    # Hot path: one MXU matmul (f32 accumulate) + broadcast bias add, all in VMEM.
    acc = jnp.dot(x_ref[...], sigma_ref[...], preferred_element_type=jnp.float32)
    o_ref[...] = (acc + mu_ref[...].astype(jnp.float32)).astype(o_ref.dtype)


def gaussian_model(x, mu, sigma, *, tm=None, use_bf16_matmul=False):
    """out[n, :] = mu + x[n, :] @ sigma   (PyTorch Gaussian_model.forward)."""
    N, D = x.shape
    assert sigma.shape == (D, D)
    assert mu.shape == (D,)
    out_dtype = x.dtype

    # Optional bf16 MXU operands (v6e/v7x bf16-native MXU fast path; halves HBM
    # bytes for x/sigma).  Accumulation and the bias add stay in f32.  Default is
    # off to preserve the exact f32 semantics of the reference module.
    if use_bf16_matmul:
        x_in = x.astype(jnp.bfloat16)
        sigma_in = sigma.astype(jnp.bfloat16)
    else:
        x_in, sigma_in = x, sigma
    mu2d = jnp.reshape(mu, (1, D)).astype(jnp.float32)

    in_itemsize = jnp.dtype(x_in.dtype).itemsize
    out_itemsize = jnp.dtype(out_dtype).itemsize

    # ---- row-tile selection --------------------------------------------------
    if tm is None:
        if N <= 1024:
            # Small problem: single grid step with whole-array blocks.  Fastest
            # schedule (no ~0.35us/step pipeline overhead) and full-array blocks
            # are always layout-legal regardless of (8,128) divisibility.
            tm = N
        else:
            # Large row tiles amortize per-step overhead and fill the MXU
            # (>=128 rows on v5e, >=256 on v6e/v7x).  Clamp so double-buffered
            # x/out tiles plus the resident sigma fit a v7x-safe VMEM budget, and
            # cap at 1024 so the grid keeps >=2 steps and dimension_semantics=
            # ("parallel",) can feed both v7x TensorCores.
            budget = 40 * 1024 * 1024
            sigma_bytes = D * D * in_itemsize
            per_row_bytes = 2 * D * (in_itemsize + out_itemsize)  # x + out, 2 buffers each
            fit = max(budget - sigma_bytes, per_row_bytes) // per_row_bytes
            tm = int(min(1024, max(256, (fit // 256) * 256)))
    tm = int(min(tm, N))

    grid = (pl.cdiv(N, tm),)

    # Explicit VMEM budget so larger tiles aren't capped by the scoped default
    # (16 MiB v5e / 32 MiB v6e+v7x): double-buffered x/out tiles + sigma + mu +
    # headroom, capped at 60 MiB to stay inside v7x's 64 MiB physical VMEM.
    # TODO(synk): for D >= 2048 sigma alone is >=16 MiB per copy; add a K grid
    # axis with a pl.when-initialized f32 accumulator (and/or a single-buffered
    # sigma via pipeline_mode=pl.Buffered(1)) instead of keeping full (D, D)
    # resident per step.
    vmem_bytes = (2 * tm * D * in_itemsize      # x tiles (double-buffered)
                  + 2 * tm * D * out_itemsize   # out tiles (double-buffered)
                  + 2 * D * D * in_itemsize     # sigma (constant index map)
                  + 2 * D * 4                   # mu
                  + (2 << 20))                  # headroom
    vmem_bytes = int(min(max(vmem_bytes, 16 << 20), 60 << 20))

    return pl.pallas_call(
        gaussian_kernel,
        out_shape=jax.ShapeDtypeStruct((N, D), out_dtype),
        grid_spec=pltpu.PrefetchScalarGridSpec(
            num_scalar_prefetch=0,
            grid=grid,
            in_specs=[
                pl.BlockSpec((tm, D), lambda i: (i, 0)),  # x row tile
                pl.BlockSpec((D, D), lambda i: (0, 0)),   # sigma, resident (constant index)
                pl.BlockSpec((1, D), lambda i: (0, 0)),   # mu, broadcast over rows
            ],
            # NOTE: for D < 128 the output lowers to masked vst.msk partial stores;
            # padding D to 128 in the wrapper only pays off when not HBM-bound, so
            # it is intentionally not done for the tiny (overhead-dominated) shape.
            out_specs=pl.BlockSpec((tm, D), lambda i: (i, 0)),
        ),
        compiler_params=pltpu.CompilerParams(
            dimension_semantics=("parallel",),
            vmem_limit_bytes=vmem_bytes,
        ),
    )(x_in, sigma_in, mu2d)


if __name__ == "__main__":
    # --- small shape matching the module's toy usage: dim=32, N=16 rows -------
    dim, N = 32, 16
    kx, km, ks = jax.random.split(jax.random.PRNGKey(0), 3)
    x = jax.random.normal(kx, (N, dim), dtype=jnp.float32)
    # Parameters shaped like the PyTorch __init__ (mu=zeros(dim), sigma=eye(dim)),
    # deterministically perturbed so the matmul is non-trivial.
    mu = 0.1 * jax.random.normal(km, (dim,), dtype=jnp.float32)
    sigma = jnp.eye(dim, dtype=jnp.float32) + 0.05 * jax.random.normal(
        ks, (dim, dim), dtype=jnp.float32)

    out = jax.block_until_ready(gaussian_model(x, mu, sigma))
    ref = mu[None, :] + x @ sigma
    assert out.shape == (N, dim)
    assert jnp.allclose(out, ref, atol=1e-5, rtol=1e-5), "f32 small-shape mismatch"

    # --- bf16 MXU-operand fast path (v6e/v7x), f32 accumulate ------------------
    out_bf16 = jax.block_until_ready(gaussian_model(x, mu, sigma, use_bf16_matmul=True))
    assert jnp.allclose(out_bf16, ref, atol=1e-1, rtol=1e-1), "bf16 path mismatch"

    # --- larger shape exercising the tiled multi-step grid (2 parallel steps) --
    N2, dim2 = 2048, 128
    k1, k2, k3 = jax.random.split(jax.random.PRNGKey(1), 3)
    x2 = jax.random.normal(k1, (N2, dim2), dtype=jnp.float32)
    mu2 = 0.1 * jax.random.normal(k2, (dim2,), dtype=jnp.float32)
    sigma2 = jnp.eye(dim2, dtype=jnp.float32) + 0.05 * jax.random.normal(
        k3, (dim2, dim2), dtype=jnp.float32)
    out2 = jax.block_until_ready(gaussian_model(x2, mu2, sigma2))
    ref2 = mu2[None, :] + x2 @ sigma2
    assert jnp.allclose(out2, ref2, atol=1e-3, rtol=1e-3), "tiled-path mismatch"

    print("KERNEL_OK")
</pallas_src>

<mosaic_0001>
module attributes {stable_mosaic.version = 11 : i64} {
  func.func @gaussian_kernel(%arg0: i32, %arg1: memref<16x32xf32, #tpu.memory_space<vmem>>, %arg2: memref<32x32xf32, #tpu.memory_space<vmem>>, %arg3: memref<1x32xf32, #tpu.memory_space<vmem>>, %arg4: memref<16x32xf32, #tpu.memory_space<vmem>>) attributes {dimension_semantics = [#tpu.dimension_semantics<parallel>], iteration_bounds = array<i64: 1>, scalar_prefetch = 0 : i64, scratch_operands = 0 : i64, tpu.core_type = #tpu.core_type<tc>, window_params = [{transform_indices = @transform_0, window_bounds = array<i64: 16, 32>}, {pipeline_mode = #tpu.pipeline_mode<synchronous>, transform_indices = @transform_1, window_bounds = array<i64: 32, 32>}, {pipeline_mode = #tpu.pipeline_mode<synchronous>, transform_indices = @transform_2, window_bounds = array<i64: 1, 32>}, {transform_indices = @transform_3, window_bounds = array<i64: 16, 32>}]} {
    %c0 = arith.constant 0 : index
    %c0_0 = arith.constant 0 : index
    %0 = vector.load %arg1[%c0, %c0_0] : memref<16x32xf32, #tpu.memory_space<vmem>>, vector<16x32xf32>
    %c0_1 = arith.constant 0 : index
    %c0_2 = arith.constant 0 : index
    %1 = vector.load %arg2[%c0_1, %c0_2] : memref<32x32xf32, #tpu.memory_space<vmem>>, vector<32x32xf32>
    %cst = arith.constant dense<0.000000e+00> : vector<16x32xf32>
    %2 = tpu.matmul %0, %1, %cst {dimension_numbers = #tpu.dot_dimension_numbers<[1], [0], [0], [1], [0, 0, 1, 1], [], []>} : vector<16x32xf32>, vector<32x32xf32>, vector<16x32xf32> -> vector<16x32xf32>
    %c0_3 = arith.constant 0 : index
    %c0_4 = arith.constant 0 : index
    %3 = vector.load %arg3[%c0_3, %c0_4] : memref<1x32xf32, #tpu.memory_space<vmem>>, vector<1x32xf32>
    %4 = vector.broadcast %3 : vector<1x32xf32> to vector<16x32xf32>
    %5 = arith.addf %2, %4 : vector<16x32xf32>
    %c0_5 = arith.constant 0 : index
    %c0_6 = arith.constant 0 : index
    %6 = vector.load %arg4[%c0_5, %c0_6] : memref<16x32xf32, #tpu.memory_space<vmem>>, vector<16x32xf32>
    tpu.vector_store %arg4[%c0_5, %c0_6], %5 {strides = array<i32>} : memref<16x32xf32, #tpu.memory_space<vmem>>, vector<16x32xf32>,
    return
  }
  func.func @transform_0(%arg0: i32) -> (i32, i32) {
    %c0_i32 = arith.constant 0 : i32
    %c0_i32_0 = arith.constant 0 : i32
    return %arg0, %c0_i32 : i32, i32
  }
  func.func @transform_1(%arg0: i32) -> (i32, i32) {
    %c0_i32 = arith.constant 0 : i32
    %c0_i32_0 = arith.constant 0 : i32
    %c0_i32_1 = arith.constant 0 : i32
    return %c0_i32, %c0_i32_0 : i32, i32
  }
  func.func @transform_2(%arg0: i32) -> (i32, i32) {
    %c0_i32 = arith.constant 0 : i32
    %c0_i32_0 = arith.constant 0 : i32
    %c0_i32_1 = arith.constant 0 : i32
    return %c0_i32, %c0_i32_0 : i32, i32
  }
  func.func @transform_3(%arg0: i32) -> (i32, i32) {
    %c0_i32 = arith.constant 0 : i32
    %c0_i32_0 = arith.constant 0 : i32
    return %arg0, %c0_i32 : i32, i32
  }
}

</mosaic_0001>

<bundles_post_ra>
// kernel: tpu_custom_call.1
= control target key start
LH: loop header
LB: loop body
LE: loop exit
PB: predicated region body
PF: predicated region fallthrough
CT: control target
= control target key end

     0   :  { %8 = vsyncpa [#allocation3], 0  ;;  %s299_s0 = inlined_call_operand.hbm [shape: f32[16,32], index: 0, kind: input, shape index: {}]   ;;  %s300_s1 = inlined_call_operand.hbm [shape: f32[32,32], index: 1, kind: input, shape index: {}]   ;;  %s301_s2 = inlined_call_operand.vmem [shape: f32[1,32], index: 2, kind: input, shape index: {}]   ;;  %s302_s3 = inlined_call_operand.hbm [shape: f32[16,32], index: 3, kind: output, shape index: {}]  }
   0x1   :  { %9 = vsyncpa [#allocation6], 0 }
   0x2   :  { %10 = vsyncpa [#allocation4], 0  ;;  %s249_s12 = smov [#allocation2]  }
   0x3   :  { %s16_s13 = sshll.u32 %s249_s12, 4  ;;  %s17_s13 = int_to_ptr.vmem [resolvable:$true] %s16_s13 }
   0x4   :  { %s191_s14 = scalar_lea.vmem %s17_s13, 256  ;;  %p196_p1 = scmp.lt.s32.totalorder %s17_s13, %s17_s13 }
   0x5   :  { %p192_p0 = scmp.ne.s32.totalorder %s17_s13, %s191_s14  ;;  %p197_p2 = scmp.lt.s32.totalorder %s191_s14, %s191_s14 }
   0x7   :  { %p198_p3 = por %p197_p2, %p196_p1 }
   0x9   :  { %p199_p4 = pnand %p198_p3, %p192_p0 }
   0xb   :  { %202 = shalt.err (!%p199_p4)
}
   0xc   :  { %s250_s15 = smov 128   ;;  %s251_s16 = smov 8  }
   0xd   :  { %22 = dma.hbm_to_vmem [thread:$0]  %s299_s0, 256, %s17_s13, [#allocation3], %s250_s15, %s250_s15, %s251_s16  }
   0xe   :  { %s252_s19 = smov [#allocation5]  }
   0xf   :  { %s28_s20 = sshll.u32 %s252_s19, 4  ;;  %s29_s20 = int_to_ptr.vmem [resolvable:$true] %s28_s20 }
  0x10   :  { %s211_s21 = scalar_lea.vmem %s29_s20, 512  ;;  %p216_p6 = scmp.lt.s32.totalorder %s29_s20, %s29_s20 }
  0x11   :  { %p212_p5 = scmp.ne.s32.totalorder %s29_s20, %s211_s21  ;;  %p217_p7 = scmp.lt.s32.totalorder %s211_s21, %s211_s21 }
  0x13   :  { %p218_p8 = por %p217_p7, %p216_p6 }
  0x15   :  { %p219_p9 = pnand %p218_p8, %p212_p5 }
  0x17   :  { %222 = shalt.err (!%p219_p9)
}
  0x18   :  { %34 = dma.hbm_to_vmem [thread:$0]  %s300_s1, 512, %s29_s20, [#allocation6], %s250_s15, %s250_s15, %s251_s16  }
  0x19   :  { %243 = dma.done.wait [#allocation3], 256  }
  0x1a   :  { %244 = vsyncadd [#allocation3], 4294967040 }
  0x1b   :  { %245 = dma.done.wait [#allocation6], 512  }
  0x1c   :  { %246 = vsyncadd [#allocation6], 4294966784  ;;  %vm56_vm0 = vcmask 261120   ;;  %v48_v0 = vld [vmem:[#allocation5 + $0x18] sm:$0xff]  ;;  %v47_v1 = vld [vmem:[#allocation5 + $0x10] sm:$0xff]  ;;  %s253_s24 = smov [#allocation7]  }
  0x1d   :  { %167 = vmatprep.subr.mxu0 %v48_v0  ;;  %v43_v2 = vld [vmem:[#allocation2] sm:$0xff]  ;;  %v46_v3 = vld [vmem:[#allocation5 + $0x8] sm:$0xff]  ;;  %v45_v4 = vld [vmem:[#allocation5] sm:$0xff]  ;;  %s145_s25 = sshll.u32 %s253_s24, 4  ;;  %s146_s25 = int_to_ptr.vmem [resolvable:$true] %s145_s25 }
  0x1e   :  { %168 = vmatpush3.msra.mxu0 %v48_v0  ;;  %175 = vmatprep.mubr.msk.f32.mxu0 %vm56_vm0, %v43_v2  ;;  %v44_v5 = vld [vmem:[#allocation2 + $0x8] sm:$0xff]  ;;  %v158_v6 = vld [vmem:[%s301_s2] ss:$0 sm:$0xff]  ;;  %s223_s26 = scalar_lea.vmem %s146_s25, 256  ;;  %p228_p11 = scmp.lt.s32.totalorder %s146_s25, %s146_s25 }
  0x1f   :  { %169 = vmatprep.subr.mxu0 %v47_v1  ;;  %p224_p10 = scmp.ne.s32.totalorder %s146_s25, %s223_s26  ;;  %p229_p12 = scmp.lt.s32.totalorder %s223_s26, %s223_s26 }
  0x20   :  { %170 = vmatpush3.msra.mxu0 %v47_v1 }
  0x21   :  { %171 = vmatprep.subr.mxu0 %v46_v3  ;;  %p230_p13 = por %p229_p12, %p228_p11 }
  0x22   :  { %172 = vmatpush3.msra.mxu0 %v46_v3 }
  0x23   :  { %173 = vmatprep.subr.mxu0 %v45_v4  ;;  %p231_p0 = pnand %p230_p13, %p224_p10 }
  0x24   :  { %174 = vmatpush3.msra.mxu0 %v45_v4 }
  0x25   :  { %176 = vmatmul.mubr.msk.f32.vlgmr.msra.gmra.mxu0 %vm56_vm0, %v44_v5 }
  0xe5   :  { %v177_v7 = vpop.f32.mrf.mxu0 }
  0xe6   :  { %v135_v8 = vadd.f32 %v177_v7, %v158_v6 }
  0xe7   :  { %v129_v9 = vpop.f32.mrf.mxu0 }
  0xe8   :  { %139 = vst.msk [vmem:[#allocation7 + $0x8] sm:$0xff] %vm56_vm0, %v135_v8  ;;  %v130_v10 = vadd.f32 %v158_v6, %v129_v9 }
  0xea   :  { %138 = vst.msk [vmem:[#allocation7] sm:$0xff] %vm56_vm0, %v130_v10 }
  0xeb   :  { %234 = shalt.err (!%p231_p0)
}
  0xec   :  { %151 = dma.vmem_to_hbm [thread:$0]  %s146_s25, 256, %s302_s3, [#allocation4], %s250_s15, %s250_s15, %s251_s16  }
  0xed   :  { %247 = dma.done.wait [#allocation4], 256  }
  0xee   :  { %248 = vsyncadd [#allocation4], 4294967040 }
  0xef   :  { %155 = vsyncpa [#allocation3], 1 }
  0xf0   :  { %156 = vsyncpa [#allocation6], 1 }
  0xf1   :  { %157 = vsyncpa [#allocation4], 1 }

</bundles_post_ra>
